<compile_context>
chip_gen: v5e
topology: v5e:2x2
jax: 0.10.0
libtpu: 0.0.40
codegen_flags: <defaults>
</compile_context>

<pallas_src>
import functools

import jax
import jax.numpy as jnp
from jax.experimental import pallas as pl
from jax.experimental.pallas import tpu as pltpu

_LANE = 128
# Combined (pred + true) bytes per pipeline stage.  Double-buffered by
# BlockSpec -> ~12 MiB of VMEM input buffers, which fits every generation's
# scoped-VMEM budget once vmem_limit_bytes is raised to 32 MiB (v5e default is
# 16 MiB; v7x has 64 MiB physical per TC, so 32 MiB leaves headroom).
_TARGET_STAGE_BYTES = 6 << 20


def _round_up(x, m):
    return (x + m - 1) // m * m


def _dice_partial_kernel(pred_ref, true_ref, inter_ref, card_ref, *,
                         from_logits, rows_total, rows_blk, k_steps,
                         needs_mask):
    """Accumulate per-sample intersection / cardinality partial sums.

    Per step: element-wise VPU (+ EUP sigmoid), one sublane reduce, and a
    tiny (N, 128) accumulate into the resident output block.  No finalize
    step and no block-sized scratch, so VMEM is free for bigger input blocks.
    """
    k = pl.program_id(1)

    @pl.when(k == 0)
    def _init():
        inter_ref[...] = jnp.zeros_like(inter_ref)
        card_ref[...] = jnp.zeros_like(card_ref)

    p = pred_ref[...].astype(jnp.float32)
    if from_logits:
        p = jax.nn.sigmoid(p)          # == F.logsigmoid(x).exp()
    t = true_ref[...].astype(jnp.float32)

    if needs_mask:
        # Ragged tail: rows beyond the true row count (unspecified padding of
        # the boundary block) are zeroed.  Select is NaN-safe.
        blk = pl.program_id(0) * k_steps + k
        row_ids = jax.lax.broadcasted_iota(jnp.int32, p.shape, 1) + blk * rows_blk
        valid = row_ids < rows_total
        p = jnp.where(valid, p, 0.0)
        t = jnp.where(valid, t, 0.0)

    inter_ref[...] += jnp.sum(p * t, axis=1)   # (N, 128)
    card_ref[...] += jnp.sum(p + t, axis=1)


def binary_dice_loss(y_pred, y_true, *, batch_dice=False, from_logits=True,
                     log_loss=False, smooth=0.0, eps=1e-7,
                     block_bytes=_TARGET_STAGE_BYTES):
    assert y_pred.shape[0] == y_true.shape[0]
    n = y_pred.shape[0]

    pred2d = y_pred.reshape(n, -1)
    true2d = y_true.reshape(n, -1)
    assert pred2d.shape == true2d.shape
    # Keep the mask narrow in HBM: bool -> int8 (1 byte); integer/float masks
    # are streamed as-is.  The widen to f32 happens in-kernel on idle VPU slots.
    if true2d.dtype == jnp.bool_:
        true2d = true2d.astype(jnp.int8)

    d = pred2d.shape[1]

    # ---- pad only to the next lane multiple (tiny / usually a no-op) --------
    d128 = _round_up(d, _LANE)
    if d128 != d:
        pred_pad = -1e9 if from_logits else 0.0   # sigmoid(-1e9) == 0
        pred2d = jnp.pad(pred2d, ((0, 0), (0, d128 - d)),
                         constant_values=pred_pad)
        true2d = jnp.pad(true2d, ((0, 0), (0, d128 - d)), constant_values=0)
    r = d128 // _LANE                              # rows of 128 lanes / sample

    pred3d = pred2d.reshape(n, r, _LANE)
    true3d = true2d.reshape(n, r, _LANE)

    # ---- tiling --------------------------------------------------------------
    # Sublane tile of the rows axis: 8 for 4-byte, 16 for 2-byte, 32 for 1-byte.
    def _align(dt):
        return 32 // jnp.dtype(dt).itemsize
    align = max(_align(pred3d.dtype), _align(true3d.dtype))

    row_bytes = n * _LANE * (jnp.dtype(pred3d.dtype).itemsize
                             + jnp.dtype(true3d.dtype).itemsize)
    rows_budget = max(1, block_bytes // row_bytes)
    if r <= rows_budget:
        rows_blk = r                               # full extent -> always legal
    else:
        # TODO(synk): for very large N, tile the batch axis too instead of
        # relying on the rows_blk floor.
        rows_blk = max(align, rows_budget // align * align)

    total_blocks = pl.cdiv(r, rows_blk)
    # Dual-TC split (v7x) only when it is exact and each core keeps pipeline
    # depth; on 1-TC chips the extra axis is a no-op.
    num_par = 2 if (total_blocks >= 8 and total_blocks % 2 == 0) else 1
    k_steps = total_blocks // num_par
    needs_mask = (total_blocks * rows_blk != r)

    kernel = functools.partial(_dice_partial_kernel,
                               from_logits=from_logits,
                               rows_total=r, rows_blk=rows_blk,
                               k_steps=k_steps, needs_mask=needs_mask)

    def in_map(p, k):
        return (0, p * k_steps + k, 0)

    def out_map(p, k):
        return (p, 0, 0)

    inter_part, card_part = pl.pallas_call(
        kernel,
        out_shape=(
            jax.ShapeDtypeStruct((num_par, n, _LANE), jnp.float32),
            jax.ShapeDtypeStruct((num_par, n, _LANE), jnp.float32),
        ),
        grid_spec=pltpu.PrefetchScalarGridSpec(
            num_scalar_prefetch=0,
            grid=(num_par, k_steps),
            in_specs=[
                pl.BlockSpec((n, rows_blk, _LANE), in_map),
                pl.BlockSpec((n, rows_blk, _LANE), in_map),
            ],
            out_specs=(
                pl.BlockSpec((None, n, _LANE), out_map),
                pl.BlockSpec((None, n, _LANE), out_map),
            ),
        ),
        compiler_params=pltpu.CompilerParams(
            dimension_semantics=("parallel", "arbitrary"),
            vmem_limit_bytes=32 * 1024 * 1024),
    )(pred3d, true3d)

    # ---- tiny scalar epilogue (N values) in plain JAX -------------------------
    inter = jnp.sum(inter_part, axis=(0, 2))       # (N,)
    card = jnp.sum(card_part, axis=(0, 2))         # (N,)
    if batch_dice:
        inter = jnp.sum(inter)
        card = jnp.sum(card)
    dice = (2.0 * inter + smooth) / jnp.maximum(card + smooth, eps)
    if log_loss:
        losses = -jnp.log(jnp.maximum(dice, eps))
    else:
        losses = 1.0 - dice
    return jnp.mean(losses)


def _reference(y_pred, y_true, *, batch_dice=False, from_logits=True,
               log_loss=False, smooth=0.0, eps=1e-7):
    bs = y_pred.shape[0]
    p = y_pred.reshape(bs, -1).astype(jnp.float32)
    t = y_true.reshape(bs, -1).astype(jnp.float32)
    if from_logits:
        p = jax.nn.sigmoid(p)
    if batch_dice:
        inter = jnp.sum(p * t)
        card = jnp.sum(p + t)
    else:
        inter = jnp.sum(p * t, axis=-1)
        card = jnp.sum(p + t, axis=-1)
    dice = (2.0 * inter + smooth) / jnp.maximum(card + smooth, eps)
    losses = -jnp.log(jnp.maximum(dice, eps)) if log_loss else 1.0 - dice
    return jnp.mean(losses)


if __name__ == "__main__":
    key = jax.random.PRNGKey(0)
    k1, k2 = jax.random.split(key)

    # y_pred: raw logits (N, C, H, W); y_true: binary mask of same shape.
    y_pred = jax.random.normal(k1, (2, 4, 16, 16), dtype=jnp.float32)
    y_true = (jax.random.uniform(k2, (2, 4, 16, 16)) > 0.5).astype(jnp.float32)

    configs = [
        dict(),
        dict(batch_dice=True),
        dict(log_loss=True, smooth=1.0),
        dict(from_logits=False),
    ]
    for cfg in configs:
        yp = jax.nn.sigmoid(y_pred) if not cfg.get("from_logits", True) else y_pred
        out = jax.block_until_ready(binary_dice_loss(yp, y_true, **cfg))
        ref = jax.block_until_ready(_reference(yp, y_true, **cfg))
        assert jnp.allclose(out, ref, atol=1e-5, rtol=1e-5), (cfg, out, ref)

    # Non-128-aligned spatial size exercises the (tiny) lane-padding path.
    y_pred2 = jax.random.normal(k1, (2, 3, 10, 10), dtype=jnp.float32)
    y_true2 = (jax.random.uniform(k2, (2, 3, 10, 10)) > 0.5).astype(jnp.float32)
    out2 = jax.block_until_ready(binary_dice_loss(y_pred2, y_true2))
    ref2 = jax.block_until_ready(_reference(y_pred2, y_true2))
    assert jnp.allclose(out2, ref2, atol=1e-5, rtol=1e-5), (out2, ref2)

    # Multi-block reduction with a ragged row tail (in-kernel masking path) and
    # a bool mask streamed as int8.
    y_pred3 = jax.random.normal(k1, (2, 8, 224, 224), dtype=jnp.float32)
    y_true3 = jax.random.uniform(k2, (2, 8, 224, 224)) > 0.5
    out3 = jax.block_until_ready(binary_dice_loss(y_pred3, y_true3))
    ref3 = jax.block_until_ready(_reference(y_pred3, y_true3))
    assert jnp.allclose(out3, ref3, atol=1e-5, rtol=1e-4), (out3, ref3)

    # Small block_bytes forces many blocks -> exercises the dual-core split
    # axis (num_par=2) together with the ragged-tail mask.
    out4 = jax.block_until_ready(
        binary_dice_loss(y_pred3, y_true3, block_bytes=96 * 1024))
    assert jnp.allclose(out4, ref3, atol=1e-5, rtol=1e-4), (out4, ref3)

    print("KERNEL_OK")
</pallas_src>

<mosaic_0001>
module attributes {stable_mosaic.version = 11 : i64} {
  func.func @_dice_partial_kernel(%arg0: i32, %arg1: i32, %arg2: memref<2x8x128xf32, #tpu.memory_space<vmem>>, %arg3: memref<2x8x128xf32, #tpu.memory_space<vmem>>, %arg4: memref<1x2x128xf32, #tpu.memory_space<vmem>>, %arg5: memref<1x2x128xf32, #tpu.memory_space<vmem>>) attributes {dimension_semantics = [#tpu.dimension_semantics<parallel>, #tpu.dimension_semantics<arbitrary>], iteration_bounds = array<i64: 1, 1>, scalar_prefetch = 0 : i64, scratch_operands = 0 : i64, tpu.core_type = #tpu.core_type<tc>, window_params = [{transform_indices = @transform_0, window_bounds = array<i64: 2, 8, 128>}, {transform_indices = @transform_1, window_bounds = array<i64: 2, 8, 128>}, {transform_indices = @transform_2, window_bounds = array<i64: 1, 2, 128>}, {transform_indices = @transform_3, window_bounds = array<i64: 1, 2, 128>}]} {
    %c0_i32 = arith.constant 0 : i32
    %0 = arith.cmpi eq, %arg1, %c0_i32 : i32
    %1 = arith.extui %0 : i1 to i32
    %c0_i32_0 = arith.constant 0 : i32
    %2 = arith.cmpi ne, %1, %c0_i32_0 : i32
    scf.if %2 {
      %cst_20 = arith.constant 0.000000e+00 : f32
      %26 = vector.broadcast %cst_20 : f32 to vector<2x128xf32>
      %c0_21 = arith.constant 0 : index
      %c0_22 = arith.constant 0 : index
      %c0_23 = arith.constant 0 : index
      %27 = vector.load %arg4[%c0_21, %c0_22, %c0_23] : memref<1x2x128xf32, #tpu.memory_space<vmem>>, vector<1x2x128xf32>
      %28 = vector.shape_cast %27 : vector<1x2x128xf32> to vector<2x128xf32>
      %29 = vector.shape_cast %26 : vector<2x128xf32> to vector<1x2x128xf32>
      tpu.vector_store %arg4[%c0_21, %c0_22, %c0_23], %29 {strides = array<i32>} : memref<1x2x128xf32, #tpu.memory_space<vmem>>, vector<1x2x128xf32>,
      %cst_24 = arith.constant 0.000000e+00 : f32
      %30 = vector.broadcast %cst_24 : f32 to vector<2x128xf32>
      %c0_25 = arith.constant 0 : index
      %c0_26 = arith.constant 0 : index
      %c0_27 = arith.constant 0 : index
      %31 = vector.load %arg5[%c0_25, %c0_26, %c0_27] : memref<1x2x128xf32, #tpu.memory_space<vmem>>, vector<1x2x128xf32>
      %32 = vector.shape_cast %31 : vector<1x2x128xf32> to vector<2x128xf32>
      %33 = vector.shape_cast %30 : vector<2x128xf32> to vector<1x2x128xf32>
      tpu.vector_store %arg5[%c0_25, %c0_26, %c0_27], %33 {strides = array<i32>} : memref<1x2x128xf32, #tpu.memory_space<vmem>>, vector<1x2x128xf32>,
    } else {
    }
    %c0 = arith.constant 0 : index
    %c0_1 = arith.constant 0 : index
    %c0_2 = arith.constant 0 : index
    %3 = vector.load %arg2[%c0, %c0_1, %c0_2] : memref<2x8x128xf32, #tpu.memory_space<vmem>>, vector<2x8x128xf32>
    %4 = arith.negf %3 : vector<2x8x128xf32>
    %5 = math.exp %4 : vector<2x8x128xf32>
    %cst = arith.constant 1.000000e+00 : f32
    %6 = vector.broadcast %cst : f32 to vector<2x8x128xf32>
    %7 = arith.addf %6, %5 : vector<2x8x128xf32>
    %8 = arith.divf %6, %7 : vector<2x8x128xf32>
    %c0_3 = arith.constant 0 : index
    %c0_4 = arith.constant 0 : index
    %c0_5 = arith.constant 0 : index
    %9 = vector.load %arg3[%c0_3, %c0_4, %c0_5] : memref<2x8x128xf32, #tpu.memory_space<vmem>>, vector<2x8x128xf32>
    %c0_6 = arith.constant 0 : index
    %c0_7 = arith.constant 0 : index
    %c0_8 = arith.constant 0 : index
    %10 = vector.load %arg4[%c0_6, %c0_7, %c0_8] : memref<1x2x128xf32, #tpu.memory_space<vmem>>, vector<1x2x128xf32>
    %11 = vector.shape_cast %10 : vector<1x2x128xf32> to vector<2x128xf32>
    %12 = arith.mulf %8, %9 : vector<2x8x128xf32>
    %cst_9 = arith.constant dense<0.000000e+00> : vector<2x128xf32>
    %13 = vector.multi_reduction <add>, %12, %cst_9 [1] : vector<2x8x128xf32> to vector<2x128xf32>
    %14 = arith.addf %11, %13 : vector<2x128xf32>
    %c0_10 = arith.constant 0 : index
    %c0_11 = arith.constant 0 : index
    %c0_12 = arith.constant 0 : index
    %15 = vector.load %arg4[%c0_10, %c0_11, %c0_12] : memref<1x2x128xf32, #tpu.memory_space<vmem>>, vector<1x2x128xf32>
    %16 = vector.shape_cast %15 : vector<1x2x128xf32> to vector<2x128xf32>
    %17 = vector.shape_cast %14 : vector<2x128xf32> to vector<1x2x128xf32>
    tpu.vector_store %arg4[%c0_10, %c0_11, %c0_12], %17 {strides = array<i32>} : memref<1x2x128xf32, #tpu.memory_space<vmem>>, vector<1x2x128xf32>,
    %c0_13 = arith.constant 0 : index
    %c0_14 = arith.constant 0 : index
    %c0_15 = arith.constant 0 : index
    %18 = vector.load %arg5[%c0_13, %c0_14, %c0_15] : memref<1x2x128xf32, #tpu.memory_space<vmem>>, vector<1x2x128xf32>
    %19 = vector.shape_cast %18 : vector<1x2x128xf32> to vector<2x128xf32>
    %20 = arith.addf %8, %9 : vector<2x8x128xf32>
    %cst_16 = arith.constant dense<0.000000e+00> : vector<2x128xf32>
    %21 = vector.multi_reduction <add>, %20, %cst_16 [1] : vector<2x8x128xf32> to vector<2x128xf32>
    %22 = arith.addf %19, %21 : vector<2x128xf32>
    %c0_17 = arith.constant 0 : index
    %c0_18 = arith.constant 0 : index
    %c0_19 = arith.constant 0 : index
    %23 = vector.load %arg5[%c0_17, %c0_18, %c0_19] : memref<1x2x128xf32, #tpu.memory_space<vmem>>, vector<1x2x128xf32>
    %24 = vector.shape_cast %23 : vector<1x2x128xf32> to vector<2x128xf32>
    %25 = vector.shape_cast %22 : vector<2x128xf32> to vector<1x2x128xf32>
    tpu.vector_store %arg5[%c0_17, %c0_18, %c0_19], %25 {strides = array<i32>} : memref<1x2x128xf32, #tpu.memory_space<vmem>>, vector<1x2x128xf32>,
    return
  }
  func.func @transform_0(%arg0: i32, %arg1: i32) -> (i32, i32, i32) {
    %c1_i32 = arith.constant 1 : i32
    %0 = arith.muli %arg0, %c1_i32 : i32
    %1 = arith.addi %0, %arg1 : i32
    %c0_i32 = arith.constant 0 : i32
    %c0_i32_0 = arith.constant 0 : i32
    %c0_i32_1 = arith.constant 0 : i32
    return %c0_i32, %1, %c0_i32_0 : i32, i32, i32
  }
  func.func @transform_1(%arg0: i32, %arg1: i32) -> (i32, i32, i32) {
    %c1_i32 = arith.constant 1 : i32
    %0 = arith.muli %arg0, %c1_i32 : i32
    %1 = arith.addi %0, %arg1 : i32
    %c0_i32 = arith.constant 0 : i32
    %c0_i32_0 = arith.constant 0 : i32
    %c0_i32_1 = arith.constant 0 : i32
    return %c0_i32, %1, %c0_i32_0 : i32, i32, i32
  }
  func.func @transform_2(%arg0: i32, %arg1: i32) -> (i32, i32, i32) {
    %c0_i32 = arith.constant 0 : i32
    %c0_i32_0 = arith.constant 0 : i32
    %c0_i32_1 = arith.constant 0 : i32
    return %arg0, %c0_i32, %c0_i32_0 : i32, i32, i32
  }
  func.func @transform_3(%arg0: i32, %arg1: i32) -> (i32, i32, i32) {
    %c0_i32 = arith.constant 0 : i32
    %c0_i32_0 = arith.constant 0 : i32
    %c0_i32_1 = arith.constant 0 : i32
    return %arg0, %c0_i32, %c0_i32_0 : i32, i32, i32
  }
}

</mosaic_0001>

<bundles_post_ra>
// kernel: tpu_custom_call.1
= control target key start
LH: loop header
LB: loop body
LE: loop exit
PB: predicated region body
PF: predicated region fallthrough
CT: control target
= control target key end

     0   :  { %9 = vsyncpa [#allocation3], 0  ;;  %s340_s0 = inlined_call_operand.hbm [shape: f32[2,8,128], index: 0, kind: input, shape index: {}]   ;;  %s341_s1 = inlined_call_operand.hbm [shape: f32[2,8,128], index: 1, kind: input, shape index: {}]   ;;  %s342_s2 = inlined_call_operand.hbm [shape: f32[1,2,128], index: 2, kind: output, shape index: {0}]   ;;  %s343_s3 = inlined_call_operand.hbm [shape: f32[1,2,128], index: 3, kind: output, shape index: {1}]  }
   0x1   :  { %10 = vsyncpa [#allocation6], 0 }
   0x2   :  { %11 = vsyncpa [#allocation4], 0 }
   0x3   :  { %12 = vsyncpa [#allocation9], 0  ;;  %s20_s14 = sshll.u32 %s340_s0, 4  ;;  %s301_s15 = smov [#allocation2]   ;;  %s21_s14 = int_to_ptr.hbm [resolvable:$true] %s20_s14 }
   0x4   :  { %s22_s16 = sshll.u32 %s301_s15, 4  ;;  %s36_s19 = sshll.u32 %s341_s1, 4  ;;  %s23_s16 = int_to_ptr.vmem [resolvable:$true] %s22_s16  ;;  %s37_s19 = int_to_ptr.hbm [resolvable:$true] %s36_s19 }
   0x5   :  { %s302_s20 = smov 128   ;;  %s303_s21 = smov 8  }
   0x6   :  { %28 = dma.hbm_to_vmem [thread:$0]  %s21_s14, 256, %s23_s16, [#allocation3], %s302_s20, %s302_s20, %s303_s21  }
   0x7   :  { %s304_s22 = smov [#allocation5]  }
   0x8   :  { %s38_s23 = sshll.u32 %s304_s22, 4  ;;  %s39_s23 = int_to_ptr.vmem [resolvable:$true] %s38_s23 }
   0x9   :  { %44 = dma.hbm_to_vmem [thread:$0]  %s37_s19, 256, %s39_s23, [#allocation6], %s302_s20, %s302_s20, %s303_s21  }
   0xa   :  { %293 = dma.done.wait [#allocation3], 256  }
   0xb   :  { %294 = vsyncadd [#allocation3], 4294967040 }
   0xc   :  { %295 = dma.done.wait [#allocation6], 256  }
   0xd   :  { %296 = vsyncadd [#allocation6], 4294967040  ;;  %v305_v0 = vmov 0.0   ;;  %v61_v1 = vld [vmem:[#allocation2] sm:$0xff]  ;;  %v62_v2 = vld [vmem:[#allocation2 + $0x8] sm:$0xff]  ;;  %vm120_vm8 = vcmask 1041409  }
   0xe   :  { %59 = vst [vmem:[#allocation7] sm:$0x3] %v305_v0  ;;  %v180_v3 = vmul.f32 -1.442695, %v61_v1  ;;  %v181_v4 = vmul.f32 -1.442695, %v62_v2 }
   0xf   :  { %60 = vst [vmem:[#allocation8] sm:$0x3] %v305_v0  ;;  %v101_v25 = vld [vmem:[#allocation5] sm:$0xff]  ;;  %v102_v27 = vld [vmem:[#allocation5 + $0x8] sm:$0xff]  ;;  %s306_s0 = smov [#allocation7]   ;;  %s153_s26 = sshll.u32 %s342_s2, 4  ;;  %s154_s26 = int_to_ptr.hbm [resolvable:$true] %s153_s26 }
  0x10   :  { %189 = vpow2.f32 %v180_v3  ;;  %s151_s1 = sshll.u32 %s306_s0, 4  ;;  %s307_s27 = smov [#allocation8]   ;;  %s152_s1 = int_to_ptr.vmem [resolvable:$true] %s151_s1 }
  0x11   :  { %191 = vpow2.f32 %v181_v4  ;;  %s162_s28 = sshll.u32 %s307_s27, 4  ;;  %s164_s4 = sshll.u32 %s343_s3, 4  ;;  %s163_s28 = int_to_ptr.vmem [resolvable:$true] %s162_s28  ;;  %s165_s4 = int_to_ptr.hbm [resolvable:$true] %s164_s4 }
  0x15   :  { %v103_v57 = vld [vmem:[#allocation7] sm:$0x3] }
  0x16   :  { %v190_v5 = vpop.eup %189  ;;  %v125_v59 = vld [vmem:[#allocation8] sm:$0x3] }
  0x17   :  { %v192_v6 = vpop.eup %191  ;;  %v69_v7 = vadd.f32 1.0, %v190_v5 }
  0x18   :  { %v70_v8 = vadd.f32 1.0, %v192_v6 }
  0x19   :  { %193 = vrcp.f32 %v69_v7  ;;  %vm76_vm0 = vweird.f32 %v69_v7  ;;  %v82_v12 = vand.u32 2147483648, %v69_v7  ;;  %v80_v15 = vand.u32 2147483647, %v69_v7 }
  0x1a   :  { %195 = vrcp.f32 %v70_v8  ;;  %v97_v16 = vand.u32 2147483648, %v70_v8  ;;  %vm91_vm2 = vweird.f32 %v70_v8  ;;  %v95_v18 = vand.u32 2147483647, %v70_v8 }
  0x1b   :  { %v83_v20 = vor.u32 1.1754944e-38, %v82_v12  ;;  %vm81_vm5 = vcmp.eq.f32.partialorder %v80_v15, 8.507059e+37 }
  0x1c   :  { %v98_v23 = vor.u32 1.1754944e-38, %v97_v16  ;;  %vm96_vm7 = vcmp.eq.f32.partialorder %v95_v18, 8.507059e+37 }
  0x1f   :  { %v194_v9 = vpop.eup %193 }
  0x20   :  { %v196_v10 = vpop.eup %195  ;;  %v72_v11 = vmul.f32 %v194_v9, %v69_v7  ;;  %vm77_vm1 = vweird.f32 %v194_v9 }
  0x21   :  { %v87_v13 = vmul.f32 %v196_v10, %v70_v8  ;;  %vm92_vm3 = vweird.f32 %v196_v10  ;;  %vm78_vm4 = vmor %vm76_vm0, %vm77_vm1 }
  0x22   :  { %v73_v14 = vsub.f32 1.0, %v72_v11  ;;  %vm93_vm6 = vmor %vm91_vm2, %vm92_vm3 }
  0x23   :  { %v88_v17 = vsub.f32 1.0, %v87_v13 }
  0x24   :  { %v74_v19 = vmul.f32 %v194_v9, %v73_v14 }
  0x25   :  { %v89_v21 = vmul.f32 %v196_v10, %v88_v17 }
  0x26   :  { %v75_v22 = vadd.f32 %v194_v9, %v74_v19 }
  0x27   :  { %v90_v24 = vadd.f32 %v196_v10, %v89_v21 }
  0x28   :  { %v79_v26 = vsel %vm78_vm4, %v194_v9, %v75_v22 }
  0x29   :  { %v84_v28 = vsel %vm81_vm5, %v83_v20, %v79_v26  ;;  %v94_v29 = vsel %vm93_vm6, %v196_v10, %v90_v24 }
  0x2a   :  { %v99_v30 = vsel %vm96_vm7, %v98_v23, %v94_v29  ;;  %v104_v31 = vmul.f32 %v101_v25, %v84_v28  ;;  %v126_v32 = vadd.f32 %v101_v25, %v84_v28 }
  0x2b   :  { %v105_v33 = vmul.f32 %v102_v27, %v99_v30  ;;  %v127_v34 = vadd.f32 %v102_v27, %v99_v30 }
  0x2c   :  { %v106_v35 = vrot.slane %v104_v31, 4  ;;  %v128_v36 = vrot.slane %v126_v32, 4 }
  0x2d   :  { %v112_v37 = vrot.slane %v105_v33, 4  ;;  %v134_v38 = vrot.slane %v127_v34, 4 }
  0x2e   :  { %v107_v39 = vadd.f32 %v106_v35, %v104_v31  ;;  %v129_v40 = vadd.f32 %v128_v36, %v126_v32 }
  0x2f   :  { %v113_v41 = vadd.f32 %v112_v37, %v105_v33  ;;  %v135_v42 = vadd.f32 %v134_v38, %v127_v34 }
  0x30   :  { %v108_v43 = vrot.slane %v107_v39, 2  ;;  %v130_v44 = vrot.slane %v129_v40, 2 }
  0x31   :  { %v114_v45 = vrot.slane %v113_v41, 2  ;;  %v136_v46 = vrot.slane %v135_v42, 2 }
  0x32   :  { %v109_v47 = vadd.f32 %v108_v43, %v107_v39  ;;  %v131_v48 = vadd.f32 %v130_v44, %v129_v40 }
  0x33   :  { %v115_v49 = vadd.f32 %v114_v45, %v113_v41  ;;  %v137_v50 = vadd.f32 %v136_v46, %v135_v42 }
  0x34   :  { %v110_v51 = vrot.slane %v109_v47, 1  ;;  %v132_v52 = vrot.slane %v131_v48, 1 }
  0x35   :  { %v116_v53 = vrot.slane %v115_v49, 1  ;;  %v138_v54 = vrot.slane %v137_v50, 1 }
  0x36   :  { %v111_v55 = vadd.f32 %v110_v51, %v109_v47  ;;  %v133_v56 = vadd.f32 %v132_v52, %v131_v48 }
  0x37   :  { %v117_v58 = vadd.f32 %v116_v53, %v115_v49  ;;  %v139_v60 = vadd.f32 %v138_v54, %v137_v50 }
  0x39   :  { %v121_v61 = vsel %vm120_vm8, %v117_v58, %v111_v55  ;;  %v142_v62 = vsel %vm120_vm8, %v139_v60, %v133_v56 }
  0x3a   :  { %v123_v63 = vadd.f32 %v121_v61, %v103_v57  ;;  %v144_v0 = vadd.f32 %v142_v62, %v125_v59 }
  0x3c   :  { %124 = vst [vmem:[#allocation7] sm:$0x3] %v123_v63 }
  0x3d   :  { %145 = vst [vmem:[#allocation8] sm:$0x3] %v144_v0  ;;  %156 = dma.vmem_to_hbm [thread:$0]  %s152_s1, 32, %s154_s26, [#allocation4]  }
  0x3e   :  { %167 = dma.vmem_to_hbm [thread:$0]  %s163_s28, 32, %s165_s4, [#allocation9]  }
  0x3f   :  { %297 = dma.done.wait [#allocation4], 32  }
  0x40   :  { %298 = vsyncadd [#allocation4], 4294967264 }
  0x41   :  { %299 = dma.done.wait [#allocation9], 32  }
  0x42   :  { %300 = vsyncadd [#allocation9], 4294967264 }
  0x43   :  { %176 = vsyncpa [#allocation3], 1 }
  0x44   :  { %177 = vsyncpa [#allocation6], 1 }
  0x45   :  { %178 = vsyncpa [#allocation4], 1 }
  0x46   :  { %179 = vsyncpa [#allocation9], 1 }

</bundles_post_ra>
